<compile_context>
chip_gen: v7x
topology: tpu7x:2x2x1
jax: 0.10.0
libtpu: 0.0.40
codegen_flags: <defaults>
</compile_context>

<pallas_src>
import functools

import jax
import jax.numpy as jnp
import numpy as np
from jax.experimental import pallas as pl
from jax.experimental.pallas import tpu as pltpu


def _conv_bn_relu_kernel(x_ref, w_ref, b_ref, o_ref, xpad_ref, pat_ref, *,
                         H, W, KH, KW, Cin, Cinp, pad):
    # x_ref   : (1, Cin, H*W)           bf16, flattened NCHW image (spatial on lanes)
    # w_ref   : (Cout, KH*KW*Cinp)      bf16, BN-scale-folded, Cin zero-padded to Cinp
    # b_ref   : (Cout, 1)               f32 folded BN bias
    # o_ref   : (1, Cout, H*W)          f32 output (lane-dense last dim, unmasked stores)
    # xpad_ref: (Cinp, LS)              bf16 scratch: zero-padded flat input
    # pat_ref : (KH*KW*Cinp, H*W)       bf16 scratch: im2col patch matrix
    HW = H * W
    base = pad * W + pad                       # image start offset in the flat scratch

    # ---- SAME padding in-kernel: zero scratch, place the image with one sliced store ----
    xpad_ref[...] = jnp.zeros(xpad_ref.shape, xpad_ref.dtype)
    xpad_ref[:Cin, base:base + HW] = x_ref[0]

    # ---- per-shift W-border masks, hoisted out of the tap loop (computed once each) ----
    lane = jax.lax.broadcasted_iota(jnp.int32, (1, HW), 1)
    if W & (W - 1) == 0:
        col = lane & (W - 1)                   # column index within an image row
    else:
        col = lane % W
    shifts = sorted({kw - pad for kw in range(KW) if kw - pad != 0})
    masks = {s: jnp.logical_and(col + s >= 0, col + s < W) for s in shifts}

    # ---- im2col: KH*KW lane-shifted views -> (KH*KW*Cinp, H*W) patch matrix ----
    for kh in range(KH):
        for kw in range(KW):
            t = kh * KW + kw
            start = base + (kh - pad) * W + (kw - pad)       # static, >= 0
            piece = xpad_ref[:, start:start + HW]            # (Cinp, HW), lane-offset slice
            shift = kw - pad
            if shift != 0:                                   # mask row wrap-around columns
                piece = jnp.where(masks[shift], piece, jnp.zeros_like(piece))
            pat_ref[t * Cinp:(t + 1) * Cinp, :] = piece      # 8-row-aligned store

    # ---- single MXU matmul (bf16 x bf16 -> f32) + folded-BN bias + ReLU epilogue ----
    acc = jnp.dot(w_ref[...], pat_ref[...], preferred_element_type=jnp.float32)
    y = jnp.maximum(acc + b_ref[...], 0.0)                   # (Cout, HW) f32
    o_ref[0] = y.astype(o_ref.dtype)


def convbnrelu_pallas(x, weight, gamma, beta, run_mean, run_var, *, eps=1e-5, k=3, p=1):
    """x: (N, Cin, H, W); weight: (Cout, Cin, KH, KW) like torch Conv2d (no bias).
    Stride=1, dilation=1, groups=1, eval-mode BatchNorm, ReLU.  Returns (N, Cout, H, W)."""
    N, Cin, H, W = x.shape
    Cout = weight.shape[0]
    KH = KW = k
    assert weight.shape == (Cout, Cin, KH, KW)
    assert p == (k - 1) // 2, "kernel implements stride-1 SAME convolution"

    HW = H * W
    Cinp = max(8, -(-Cin // 8) * 8)            # pad Cin to the sublane tile -> aligned rows
    base = p * W + p
    LS = -(-(HW + 2 * base) // 128) * 128      # flat scratch length, lane-tile aligned

    # ---- fold eval-mode BatchNorm into the conv (one-time, in the wrapper) ----
    scale = gamma / jnp.sqrt(run_var + eps)                              # (Cout,)
    bias = (beta - run_mean * scale).reshape(Cout, 1).astype(jnp.float32)
    w_f = jnp.transpose(weight, (2, 3, 1, 0)) * scale                    # (KH,KW,Cin,Cout)
    w_f = jnp.pad(w_f, ((0, 0), (0, 0), (0, Cinp - Cin), (0, 0)))        # zero-pad Cin
    w_mat = w_f.reshape(KH * KW * Cinp, Cout).T.astype(jnp.bfloat16)     # (Cout, K*K*Cinp)

    # NCHW -> flat spatial on lanes (free reshape); bf16 halves the input DMA bytes.
    x_flat = x.reshape(N, Cin, HW).astype(jnp.bfloat16)

    kernel = functools.partial(_conv_bn_relu_kernel, H=H, W=W, KH=KH, KW=KW,
                               Cin=Cin, Cinp=Cinp, pad=p)

    out_flat = pl.pallas_call(
        kernel,
        out_shape=jax.ShapeDtypeStruct((N, Cout, HW), jnp.float32),
        grid_spec=pltpu.PrefetchScalarGridSpec(
            num_scalar_prefetch=0,
            grid=(N,),
            in_specs=[
                pl.BlockSpec((1, Cin, HW), lambda b: (b, 0, 0)),
                pl.BlockSpec((Cout, KH * KW * Cinp), lambda b: (0, 0)),
                pl.BlockSpec((Cout, 1), lambda b: (0, 0)),
            ],
            out_specs=pl.BlockSpec((1, Cout, HW), lambda b: (b, 0, 0)),
            scratch_shapes=[
                pltpu.VMEM((Cinp, LS), jnp.bfloat16),             # zero-padded flat input
                pltpu.VMEM((KH * KW * Cinp, HW), jnp.bfloat16),   # im2col patch matrix
            ],
        ),
        compiler_params=pltpu.CompilerParams(dimension_semantics=("parallel",)),
    )(x_flat, w_mat, bias)

    return out_flat.reshape(N, Cout, H, W)     # free reshape back to NCHW


def _reference(x, weight, gamma, beta, run_mean, run_var, eps=1e-5, p=1,
               quantize_bf16=False):
    scale = gamma / jnp.sqrt(run_var + eps)
    w = weight * scale[:, None, None, None]            # BN scale folded into weights
    b = (beta - run_mean * scale).reshape(1, -1, 1, 1)
    xr = x
    if quantize_bf16:                                   # mirror the kernel's bf16 operands
        xr = xr.astype(jnp.bfloat16).astype(jnp.float32)
        w = w.astype(jnp.bfloat16).astype(jnp.float32)
    y = jax.lax.conv_general_dilated(
        xr.astype(jnp.float32), w.astype(jnp.float32),
        window_strides=(1, 1), padding=((p, p), (p, p)),
        dimension_numbers=("NCHW", "OIHW", "NCHW"),
        precision=jax.lax.Precision.HIGHEST)
    return jnp.maximum(y + b, 0.0)


if __name__ == "__main__":
    key = jax.random.PRNGKey(0)
    N, Cin, Cout, H, W, K = 2, 4, 8, 16, 16, 3

    k_x, k_w, k_g, k_b, k_m, k_v = jax.random.split(key, 6)
    x = jax.random.normal(k_x, (N, Cin, H, W), jnp.float32)
    fan_in = Cin * K * K
    bound = 1.0 / np.sqrt(fan_in)
    weight = jax.random.uniform(k_w, (Cout, Cin, K, K), jnp.float32, -bound, bound)
    gamma = 1.0 + 0.1 * jax.random.normal(k_g, (Cout,), jnp.float32)
    beta = 0.1 * jax.random.normal(k_b, (Cout,), jnp.float32)
    run_mean = 0.1 * jax.random.normal(k_m, (Cout,), jnp.float32)
    run_var = jnp.abs(1.0 + 0.1 * jax.random.normal(k_v, (Cout,), jnp.float32))

    out = convbnrelu_pallas(x, weight, gamma, beta, run_mean, run_var)
    out = jax.block_until_ready(out)

    # Tight check against a reference using the same bf16-quantized operands
    # (bf16 x bf16 products are exact in f32; both sides accumulate in f32).
    ref_q = _reference(x, weight, gamma, beta, run_mean, run_var, quantize_bf16=True)
    np.testing.assert_allclose(np.asarray(out), np.asarray(ref_q), atol=1e-4, rtol=1e-4)

    # Loose sanity check against the pure-f32 module semantics (bf16 quantization noise).
    ref_f = _reference(x, weight, gamma, beta, run_mean, run_var, quantize_bf16=False)
    np.testing.assert_allclose(np.asarray(out), np.asarray(ref_f), atol=5e-2, rtol=5e-2)

    print("KERNEL_OK")
</pallas_src>

<mosaic_0001>
module attributes {stable_mosaic.version = 11 : i64} {
  func.func @_conv_bn_relu_kernel(%arg0: i32, %arg1: memref<1x4x256xbf16, #tpu.memory_space<vmem>>, %arg2: memref<8x72xbf16, #tpu.memory_space<vmem>>, %arg3: memref<8x1xf32, #tpu.memory_space<vmem>>, %arg4: memref<1x8x256xf32, #tpu.memory_space<vmem>>, %arg5: memref<8x384xbf16, #tpu.memory_space<vmem>>, %arg6: memref<72x256xbf16, #tpu.memory_space<vmem>>) attributes {dimension_semantics = [#tpu.dimension_semantics<parallel>], iteration_bounds = array<i64: 2>, scalar_prefetch = 0 : i64, scratch_operands = 2 : i64, tpu.core_type = #tpu.core_type<tc>, window_params = [{transform_indices = @transform_0, window_bounds = array<i64: 1, 4, 256>}, {pipeline_mode = #tpu.pipeline_mode<synchronous>, transform_indices = @transform_1, window_bounds = array<i64: 8, 72>}, {pipeline_mode = #tpu.pipeline_mode<synchronous>, transform_indices = @transform_2, window_bounds = array<i64: 8, 1>}, {transform_indices = @transform_3, window_bounds = array<i64: 1, 8, 256>}]} {
    %cst = arith.constant 0.000000e+00 : bf16
    %0 = vector.broadcast %cst : bf16 to vector<8x384xbf16>
    %c0 = arith.constant 0 : index
    %c0_0 = arith.constant 0 : index
    %1 = vector.load %arg5[%c0, %c0_0] : memref<8x384xbf16, #tpu.memory_space<vmem>>, vector<8x384xbf16>
    tpu.vector_store %arg5[%c0, %c0_0], %0 {strides = array<i32>} : memref<8x384xbf16, #tpu.memory_space<vmem>>, vector<8x384xbf16>,
    %c0_1 = arith.constant 0 : index
    %c0_2 = arith.constant 0 : index
    %c0_3 = arith.constant 0 : index
    %2 = vector.load %arg1[%c0_1, %c0_2, %c0_3] : memref<1x4x256xbf16, #tpu.memory_space<vmem>>, vector<1x4x256xbf16>
    %3 = vector.shape_cast %2 : vector<1x4x256xbf16> to vector<4x256xbf16>
    %c0_4 = arith.constant 0 : index
    %c17 = arith.constant 17 : index
    %4 = vector.load %arg5[%c0_4, %c17] : memref<8x384xbf16, #tpu.memory_space<vmem>>, vector<4x256xbf16>
    tpu.vector_store %arg5[%c0_4, %c17], %3 {strides = array<i32>} : memref<8x384xbf16, #tpu.memory_space<vmem>>, vector<4x256xbf16>,
    %5 = tpu.iota {dimensions = array<i32: 1>} : vector<1x256xi32>
    %c15_i32 = arith.constant 15 : i32
    %6 = vector.broadcast %c15_i32 : i32 to vector<1x256xi32>
    %7 = arith.andi %5, %6 : vector<1x256xi32>
    %c-1_i32 = arith.constant -1 : i32
    %8 = vector.broadcast %c-1_i32 : i32 to vector<1x256xi32>
    %9 = arith.addi %7, %8 : vector<1x256xi32>
    %c0_i32 = arith.constant 0 : i32
    %10 = vector.broadcast %c0_i32 : i32 to vector<1x256xi32>
    %11 = arith.cmpi sge, %9, %10 : vector<1x256xi32>
    %c-1_i32_5 = arith.constant -1 : i32
    %12 = vector.broadcast %c-1_i32_5 : i32 to vector<1x256xi32>
    %13 = arith.addi %7, %12 : vector<1x256xi32>
    %c16_i32 = arith.constant 16 : i32
    %14 = vector.broadcast %c16_i32 : i32 to vector<1x256xi32>
    %15 = arith.cmpi slt, %13, %14 : vector<1x256xi32>
    %16 = arith.andi %11, %15 : vector<1x256xi1>
    %c1_i32 = arith.constant 1 : i32
    %17 = vector.broadcast %c1_i32 : i32 to vector<1x256xi32>
    %18 = arith.addi %7, %17 : vector<1x256xi32>
    %c0_i32_6 = arith.constant 0 : i32
    %19 = vector.broadcast %c0_i32_6 : i32 to vector<1x256xi32>
    %20 = arith.cmpi sge, %18, %19 : vector<1x256xi32>
    %c1_i32_7 = arith.constant 1 : i32
    %21 = vector.broadcast %c1_i32_7 : i32 to vector<1x256xi32>
    %22 = arith.addi %7, %21 : vector<1x256xi32>
    %c16_i32_8 = arith.constant 16 : i32
    %23 = vector.broadcast %c16_i32_8 : i32 to vector<1x256xi32>
    %24 = arith.cmpi slt, %22, %23 : vector<1x256xi32>
    %25 = arith.andi %20, %24 : vector<1x256xi1>
    %c0_9 = arith.constant 0 : index
    %c0_10 = arith.constant 0 : index
    %26 = vector.load %arg5[%c0_9, %c0_10] : memref<8x384xbf16, #tpu.memory_space<vmem>>, vector<8x256xbf16>
    %cst_11 = arith.constant 0.000000e+00 : bf16
    %27 = vector.broadcast %cst_11 : bf16 to vector<8x256xbf16>
    %28 = vector.shape_cast %16 : vector<1x256xi1> to vector<1x256xi1>
    %29 = vector.broadcast %28 : vector<1x256xi1> to vector<8x256xi1>
    %30 = arith.select %29, %26, %27 : vector<8x256xi1>, vector<8x256xbf16>
    %c0_12 = arith.constant 0 : index
    %c0_13 = arith.constant 0 : index
    %31 = vector.load %arg6[%c0_12, %c0_13] : memref<72x256xbf16, #tpu.memory_space<vmem>>, vector<8x256xbf16>
    tpu.vector_store %arg6[%c0_12, %c0_13], %30 {strides = array<i32>} : memref<72x256xbf16, #tpu.memory_space<vmem>>, vector<8x256xbf16>,
    %c0_14 = arith.constant 0 : index
    %c1 = arith.constant 1 : index
    %32 = vector.load %arg5[%c0_14, %c1] : memref<8x384xbf16, #tpu.memory_space<vmem>>, vector<8x256xbf16>
    %c8 = arith.constant 8 : index
    %c0_15 = arith.constant 0 : index
    %33 = vector.load %arg6[%c8, %c0_15] : memref<72x256xbf16, #tpu.memory_space<vmem>>, vector<8x256xbf16>
    tpu.vector_store %arg6[%c8, %c0_15], %32 {strides = array<i32>} : memref<72x256xbf16, #tpu.memory_space<vmem>>, vector<8x256xbf16>,
    %c0_16 = arith.constant 0 : index
    %c2 = arith.constant 2 : index
    %34 = vector.load %arg5[%c0_16, %c2] : memref<8x384xbf16, #tpu.memory_space<vmem>>, vector<8x256xbf16>
    %cst_17 = arith.constant 0.000000e+00 : bf16
    %35 = vector.broadcast %cst_17 : bf16 to vector<8x256xbf16>
    %36 = vector.shape_cast %25 : vector<1x256xi1> to vector<1x256xi1>
    %37 = vector.broadcast %36 : vector<1x256xi1> to vector<8x256xi1>
    %38 = arith.select %37, %34, %35 : vector<8x256xi1>, vector<8x256xbf16>
    %c16 = arith.constant 16 : index
    %c0_18 = arith.constant 0 : index
    %39 = vector.load %arg6[%c16, %c0_18] : memref<72x256xbf16, #tpu.memory_space<vmem>>, vector<8x256xbf16>
    tpu.vector_store %arg6[%c16, %c0_18], %38 {strides = array<i32>} : memref<72x256xbf16, #tpu.memory_space<vmem>>, vector<8x256xbf16>,
    %c0_19 = arith.constant 0 : index
    %c16_20 = arith.constant 16 : index
    %40 = vector.load %arg5[%c0_19, %c16_20] : memref<8x384xbf16, #tpu.memory_space<vmem>>, vector<8x256xbf16>
    %cst_21 = arith.constant 0.000000e+00 : bf16
    %41 = vector.broadcast %cst_21 : bf16 to vector<8x256xbf16>
    %42 = vector.shape_cast %16 : vector<1x256xi1> to vector<1x256xi1>
    %43 = vector.broadcast %42 : vector<1x256xi1> to vector<8x256xi1>
    %44 = arith.select %43, %40, %41 : vector<8x256xi1>, vector<8x256xbf16>
    %c24 = arith.constant 24 : index
    %c0_22 = arith.constant 0 : index
    %45 = vector.load %arg6[%c24, %c0_22] : memref<72x256xbf16, #tpu.memory_space<vmem>>, vector<8x256xbf16>
    tpu.vector_store %arg6[%c24, %c0_22], %44 {strides = array<i32>} : memref<72x256xbf16, #tpu.memory_space<vmem>>, vector<8x256xbf16>,
    %c0_23 = arith.constant 0 : index
    %c17_24 = arith.constant 17 : index
    %46 = vector.load %arg5[%c0_23, %c17_24] : memref<8x384xbf16, #tpu.memory_space<vmem>>, vector<8x256xbf16>
    %c32 = arith.constant 32 : index
    %c0_25 = arith.constant 0 : index
    %47 = vector.load %arg6[%c32, %c0_25] : memref<72x256xbf16, #tpu.memory_space<vmem>>, vector<8x256xbf16>
    tpu.vector_store %arg6[%c32, %c0_25], %46 {strides = array<i32>} : memref<72x256xbf16, #tpu.memory_space<vmem>>, vector<8x256xbf16>,
    %c0_26 = arith.constant 0 : index
    %c18 = arith.constant 18 : index
    %48 = vector.load %arg5[%c0_26, %c18] : memref<8x384xbf16, #tpu.memory_space<vmem>>, vector<8x256xbf16>
    %cst_27 = arith.constant 0.000000e+00 : bf16
    %49 = vector.broadcast %cst_27 : bf16 to vector<8x256xbf16>
    %50 = vector.shape_cast %25 : vector<1x256xi1> to vector<1x256xi1>
    %51 = vector.broadcast %50 : vector<1x256xi1> to vector<8x256xi1>
    %52 = arith.select %51, %48, %49 : vector<8x256xi1>, vector<8x256xbf16>
    %c40 = arith.constant 40 : index
    %c0_28 = arith.constant 0 : index
    %53 = vector.load %arg6[%c40, %c0_28] : memref<72x256xbf16, #tpu.memory_space<vmem>>, vector<8x256xbf16>
    tpu.vector_store %arg6[%c40, %c0_28], %52 {strides = array<i32>} : memref<72x256xbf16, #tpu.memory_space<vmem>>, vector<8x256xbf16>,
    %c0_29 = arith.constant 0 : index
    %c32_30 = arith.constant 32 : index
    %54 = vector.load %arg5[%c0_29, %c32_30] : memref<8x384xbf16, #tpu.memory_space<vmem>>, vector<8x256xbf16>
    %cst_31 = arith.constant 0.000000e+00 : bf16
    %55 = vector.broadcast %cst_31 : bf16 to vector<8x256xbf16>
    %56 = vector.shape_cast %16 : vector<1x256xi1> to vector<1x256xi1>
    %57 = vector.broadcast %56 : vector<1x256xi1> to vector<8x256xi1>
    %58 = arith.select %57, %54, %55 : vector<8x256xi1>, vector<8x256xbf16>
    %c48 = arith.constant 48 : index
    %c0_32 = arith.constant 0 : index
    %59 = vector.load %arg6[%c48, %c0_32] : memref<72x256xbf16, #tpu.memory_space<vmem>>, vector<8x256xbf16>
    tpu.vector_store %arg6[%c48, %c0_32], %58 {strides = array<i32>} : memref<72x256xbf16, #tpu.memory_space<vmem>>, vector<8x256xbf16>,
    %c0_33 = arith.constant 0 : index
    %c33 = arith.constant 33 : index
    %60 = vector.load %arg5[%c0_33, %c33] : memref<8x384xbf16, #tpu.memory_space<vmem>>, vector<8x256xbf16>
    %c56 = arith.constant 56 : index
    %c0_34 = arith.constant 0 : index
    %61 = vector.load %arg6[%c56, %c0_34] : memref<72x256xbf16, #tpu.memory_space<vmem>>, vector<8x256xbf16>
    tpu.vector_store %arg6[%c56, %c0_34], %60 {strides = array<i32>} : memref<72x256xbf16, #tpu.memory_space<vmem>>, vector<8x256xbf16>,
    %c0_35 = arith.constant 0 : index
    %c34 = arith.constant 34 : index
    %62 = vector.load %arg5[%c0_35, %c34] : memref<8x384xbf16, #tpu.memory_space<vmem>>, vector<8x256xbf16>
    %cst_36 = arith.constant 0.000000e+00 : bf16
    %63 = vector.broadcast %cst_36 : bf16 to vector<8x256xbf16>
    %64 = vector.shape_cast %25 : vector<1x256xi1> to vector<1x256xi1>
    %65 = vector.broadcast %64 : vector<1x256xi1> to vector<8x256xi1>
    %66 = arith.select %65, %62, %63 : vector<8x256xi1>, vector<8x256xbf16>
    %c64 = arith.constant 64 : index
    %c0_37 = arith.constant 0 : index
    %67 = vector.load %arg6[%c64, %c0_37] : memref<72x256xbf16, #tpu.memory_space<vmem>>, vector<8x256xbf16>
    tpu.vector_store %arg6[%c64, %c0_37], %66 {strides = array<i32>} : memref<72x256xbf16, #tpu.memory_space<vmem>>, vector<8x256xbf16>,
    %c0_38 = arith.constant 0 : index
    %c0_39 = arith.constant 0 : index
    %68 = vector.load %arg2[%c0_38, %c0_39] : memref<8x72xbf16, #tpu.memory_space<vmem>>, vector<8x72xbf16>
    %c0_40 = arith.constant 0 : index
    %c0_41 = arith.constant 0 : index
    %69 = vector.load %arg6[%c0_40, %c0_41] : memref<72x256xbf16, #tpu.memory_space<vmem>>, vector<72x256xbf16>
    %cst_42 = arith.constant dense<0.000000e+00> : vector<8x256xf32>
    %70 = tpu.matmul %68, %69, %cst_42 {dimension_numbers = #tpu.dot_dimension_numbers<[1], [0], [0], [1], [0, 0, 1, 1], [], []>} : vector<8x72xbf16>, vector<72x256xbf16>, vector<8x256xf32> -> vector<8x256xf32>
    %c0_43 = arith.constant 0 : index
    %c0_44 = arith.constant 0 : index
    %71 = vector.load %arg3[%c0_43, %c0_44] : memref<8x1xf32, #tpu.memory_space<vmem>>, vector<8x1xf32>
    %72 = vector.broadcast %71 : vector<8x1xf32> to vector<8x256xf32>
    %73 = arith.addf %70, %72 : vector<8x256xf32>
    %cst_45 = arith.constant 0.000000e+00 : f32
    %74 = vector.broadcast %cst_45 : f32 to vector<8x256xf32>
    %75 = arith.maximumf %73, %74 : vector<8x256xf32>
    %c0_46 = arith.constant 0 : index
    %c0_47 = arith.constant 0 : index
    %c0_48 = arith.constant 0 : index
    %76 = vector.load %arg4[%c0_46, %c0_47, %c0_48] : memref<1x8x256xf32, #tpu.memory_space<vmem>>, vector<1x8x256xf32>
    %77 = vector.shape_cast %76 : vector<1x8x256xf32> to vector<8x256xf32>
    %78 = vector.shape_cast %75 : vector<8x256xf32> to vector<1x8x256xf32>
    tpu.vector_store %arg4[%c0_46, %c0_47, %c0_48], %78 {strides = array<i32>} : memref<1x8x256xf32, #tpu.memory_space<vmem>>, vector<1x8x256xf32>,
    return
  }
  func.func @transform_0(%arg0: i32) -> (i32, i32, i32) {
    %c0_i32 = arith.constant 0 : i32
    %c0_i32_0 = arith.constant 0 : i32
    %c0_i32_1 = arith.constant 0 : i32
    return %arg0, %c0_i32, %c0_i32_0 : i32, i32, i32
  }
  func.func @transform_1(%arg0: i32) -> (i32, i32) {
    %c0_i32 = arith.constant 0 : i32
    %c0_i32_0 = arith.constant 0 : i32
    %c0_i32_1 = arith.constant 0 : i32
    return %c0_i32, %c0_i32_0 : i32, i32
  }
  func.func @transform_2(%arg0: i32) -> (i32, i32) {
    %c0_i32 = arith.constant 0 : i32
    %c0_i32_0 = arith.constant 0 : i32
    %c0_i32_1 = arith.constant 0 : i32
    return %c0_i32, %c0_i32_0 : i32, i32
  }
  func.func @transform_3(%arg0: i32) -> (i32, i32, i32) {
    %c0_i32 = arith.constant 0 : i32
    %c0_i32_0 = arith.constant 0 : i32
    %c0_i32_1 = arith.constant 0 : i32
    return %arg0, %c0_i32, %c0_i32_0 : i32, i32, i32
  }
}

</mosaic_0001>

<bundles_post_ra>
// kernel: tpu_custom_call.1
= control target key start
LH: loop header
LB: loop body
LE: loop exit
PB: predicated region body
PF: predicated region fallthrough
CT: control target
= control target key end

     0   :  { %8 = vsyncpa [#allocation5], 0  ;;  %s908_s0 = inlined_call_operand.vmem [shape: bf16[2,4,256], index: 0, kind: input, shape index: {}]   ;;  %s909_s1 = inlined_call_operand.vmem [shape: bf16[8,72], index: 1, kind: input, shape index: {}]   ;;  %s910_s2 = inlined_call_operand.vmem [shape: f32[8,1], index: 2, kind: input, shape index: {}]   ;;  %s911_s3 = inlined_call_operand.hbm [shape: f32[2,8,256], index: 3, kind: output, shape index: {}]  }
   0x1   :  { %10 = vsyncpa [#allocation5 + $0x1], 0  ;;  %s771_s12 = smov 0   ;;  %s773_s13 = smov 0  }
   0x2   :  { %s775_s14 = smov 0   ;;  %s777_s15 = smov 0  }
   0x3 LB: > { %s792_s16 = sadd.s32 4294967295, %s733_s15   ;;  %s589_s17 = sadd.s32 4294967294, %s733_s15   ;;  %s733_s15 = sphi %s777_s15, %s919_s15   ;;  %s729_s14 = sphi %s775_s14, %s918_s14   ;;  %s725_s13 = sphi %s773_s13, %s917_s13   ;;  %s721_s12 = sphi %s771_s12, %s916_s12  }
   0x4   : > { %s796_s18 = sadd.s32 1, %s733_s15   ;;  %s91_s19 = sadd.s32 1, %s729_s14 }
   0x5   : > { %s88_s20 = ssub.s32 %s733_s15, %s796_s18  ;;  %p101_p0 = scmp.ne.s32.totalorder %s729_s14, %s725_s13 }
   0x6   : > { %p89_p1 = scmp.eq.s32.totalorder %s88_s20, 0  ;;  %p102_p2 = scmp.eq.s32.totalorder %s792_s16, 1 }
   0x7   : > { %p107_p3 = scmp.ne.s32.totalorder %s725_s13, %s721_s12  ;;  %p108_p4 = scmp.eq.s32.totalorder %s589_s17, 1 }
   0x8   : > { %s807_s21 = scalar_select %p89_p1, %s729_s14, %s91_s19  }
   0x9   : > { %p809_p5 = por %p102_p2, %p101_p0  ;;  %p813_p6 = por %p108_p4, %p107_p3 }
   0xa   : > { %p592_p7 = scmp.ge.s32.totalorder %s733_s15, 1  ;;  %p140_p8 = scmp.lt.s32.totalorder %s733_s15, 3 }
   0xc   : > { %p141_p9 = pnand %p592_p7, %p140_p8 }
   0xd   : > { %p164_p10 = scmp.lt.s32.totalorder (!%p141_p9), %s792_s16, 1  ;;  %v196_v0 = vlaneseq (!%p141_p9)  ;;  %v735_v1 = vmov (!%p141_p9), 0   ;;  %s736_s29 = smov (!%p141_p9), 17   ;;  %vm190_vm6 = vcmask (!%p141_p9), 1041544   ;;  %vm191_vm7 = vcmask (!%p141_p9), 1045508   ;;  %v408_v51 = vld [vmem:[%s910_s2] sm:$0xff] (!%p141_p9) }
   0xe   : > { %144 = sbr.rel (%p141_p9) target bundleno = 536 (0x218), region = 32  ;;  %172 = vst [vmem:[#allocation2] sm:$0xff] (!%p141_p9), %v735_v1  ;;  %173 = vst [vmem:[#allocation2 + $0x8] sm:$0xf] (!%p141_p9), %v735_v1  ;;  %502 = vmatprep.mubr.bf16.mxu0 (!%p141_p9), %v735_v1  ;;  %670 = vset.pattern.permute.xlu0 (!%p141_p9), %v735_v1  ;;  %s737_s30 = smov (!%p141_p9), 16   ;;  %vm186_vm8 = vcmask (!%p141_p9), 138240  }
   0xf   : > { %v197_v2 = vand.u32 (!%p141_p9), 127, %v196_v0  ;;  %s738_s4 = smov (!%p141_p9), 2   ;;  %s739_s5 = smov (!%p141_p9), 18   ;;  %vm194_vm9 = vcmask (!%p141_p9), 132096   ;;  %vm192_vm10 = vmor (!%p141_p9), %vm191_vm7, %vm190_vm6  ;;  %vm252_vm11 = vcmask (!%p141_p9), 15360   ;;  %vm277_vm12 = vcmask (!%p141_p9), 130048  }
  0x10   : > { %s740_s6 = smov (!%p141_p9), 32   ;;  %s741_s7 = smov (!%p141_p9), 34   ;;  %vm316_vm15 = vcmask (!%p141_p9), 146432   ;;  %vm379_vm6 = vcmask (!%p141_p9), 277504  }
  0x11   : > { %v198_v3 = vadd.s32 (!%p141_p9), 128, %v197_v2  ;;  %v199_v4 = vand.u32 (!%p141_p9), 15, %v197_v2  ;;  %s742_s8 = smov (!%p141_p9), 127   ;;  %s743_s9 = smov (!%p141_p9), 111  }
  0x12   : > { %s744_s10 = smov (!%p141_p9), 95   ;;  %s745_s11 = smov (!%p141_p9), 126  }
  0x13   : > { %v200_v6 = vand.u32 (!%p141_p9), 15, %v198_v3  ;;  %v201_v7 = vadd.s32 (!%p141_p9), 4294967295, %v199_v4  ;;  %v209_v8 = vadd.s32 (!%p141_p9), 1, %v199_v4  ;;  %s746_s17 = smov (!%p141_p9), 112   ;;  %s747_s19 = smov (!%p141_p9), 110  }
  0x14   : > { %s748_s20 = smov (!%p141_p9), 96  }
  0x15   : > { %s165_s24 = scalar_select %p164_p10, %s792_s16, 1  ;;  %v202_v9 = vadd.s32 4294967295, %v200_v6  ;;  %vm203_vm0 = vcmp.ge.s32.totalorder %v201_v7, 0  ;;  %v210_v10 = vadd.s32 1, %v200_v6  ;;  %vm213_vm1 = vcmp.lt.s32.totalorder %v209_v8, 16 }
  0x17   : > { %s614_s25 = sshll.u32 %s165_s24, 2  ;;  %vm204_vm2 = vcmp.ge.s32.totalorder %v202_v9, 0  ;;  %vm214_vm3 = vcmp.lt.s32.totalorder %v210_v10, 16  ;;  %s749_s24 = smov 94  }
  0x18   : > { %s168_s28 = scalar_lea.vmem %s908_s0, %s614_s25  ;;  %vm824_vm4 = vmpackc.low %vm204_vm2, %vm203_vm0  ;;  %vm340_vm2 = vcmask 261120  }
  0x19   : > { %v596_v5 = vld.sshfl [vmem:[%s168_s28] sm:$0x33 pattern:$0x76325410]  ;;  %v273_v12 = vsel %vm824_vm4, 65537, %v735_v1  ;;  %vm247_vm5 = vmpackc.low %vm214_vm3, %vm213_vm1 }
  0x1a   : > { %183 = vrot.lane.b32.xlu0 %v596_v5, %s736_s29  ;;  %274 = vrot.lane.b32.xlu1 %v273_v12, %s737_s30  ;;  %v248_v13 = vsel %vm247_vm5, 65537, %v735_v1  ;;  %s161_s29 = sand.u32 1, %s725_s13  }
  0x1b   : > { %s593_s30 = sshll.u32 %s161_s29, 4 }
  0x1e   : > { %249 = vrot.lane.b32.xlu0 %v248_v13, %s738_s4  ;;  %313 = vrot.lane.b32.xlu1 %v248_v13, %s739_s5  ;;  %s615_s4 = sshll.u32 %s792_s16, 8  ;;  %s163_s5 = scalar_lea.vmem [#allocation4], %s593_s30 }
  0x1f   : > { %s516_s16 = scalar_lea.sflag [#allocation5], %s161_s29 }
  0x22   : > { %337 = vrot.lane.b32.xlu0 %v273_v12, %s740_s6  ;;  %376 = vrot.lane.b32.xlu1 %v248_v13, %s741_s7  ;;  %s530_s6 = sshll.u32 %s163_s5, 4  ;;  %s868_s6 = int_to_ptr.vmem [resolvable:$true] %s530_s6 }
  0x8c   : > { %v184_v14 = vpop.permute.xlu0 %183  ;;  %v275_v20 = vpop.permute.xlu1 %274 }
  0x8d   : > { %v185_v15 = vrot.slane %v184_v14, 4  ;;  %v276_v23 = vrot.slane %v275_v20, 4 }
  0x8f   : > { %v187_v16 = vsel %vm186_vm8, %v185_v15, %v184_v14  ;;  %195 = vst.msk [vmem:[#allocation2 + $0x8] sm:$0x3] %vm194_vm9, %v185_v15  ;;  %v278_v28 = vsel %vm277_vm12, %v276_v23, %v275_v20  ;;  %vm280_vm0 = vcmp.ne.s16.totalorder %v276_v23, 0  ;;  %vm237_vm12 = vcmask 1039360  }
  0x90   : > { %193 = vst.msk [vmem:[#allocation2] sm:$0x33] %vm192_vm10, %v187_v16  ;;  %v250_v17 = vpop.permute.xlu0 %249  ;;  %v314_v25 = vpop.permute.xlu1 %313  ;;  %vm279_vm1 = vcmp.ne.s16.totalorder %v278_v28, 0 }
  0x91   : > { %v251_v21 = vrot.slane %v250_v17, 4  ;;  %v315_v29 = vrot.slane %v314_v25, 4 }
  0x93   : > { %v253_v24 = vsel %vm252_vm11, %v251_v21, %v250_v17  ;;  %vm255_vm13 = vcmp.ne.s16.totalorder %v251_v21, 0  ;;  %v317_v34 = vsel %vm316_vm15, %v315_v29, %v314_v25  ;;  %vm319_vm3 = vcmp.ne.s16.totalorder %v315_v29, 0 }
  0x94   : > { %vm254_vm14 = vcmp.ne.s16.totalorder %v253_v24, 0  ;;  %v338_v30 = vpop.permute.xlu0 %337  ;;  %v377_v36 = vpop.permute.xlu1 %376  ;;  %vm318_vm5 = vcmp.ne.s16.totalorder %v317_v34, 0  ;;  %vm235_vm11 = vcmask 1043456   ;;  %vm331_vm15 = vcmask 900096  }
  0x95   : > { %v339_v35 = vrot.slane %v338_v30, 4  ;;  %v378_v40 = vrot.slane %v377_v36, 4 }
  0x96   : > { %v226_v18 = vld [vmem:[#allocation2 + $0x8] sm:$0xf] }
  0x97   : > { %231 = vrot.lane.b32.xlu1 %v226_v18, %s742_s8  ;;  %v830_v19 = vld [vmem:[#allocation2] sm:$0xff]  ;;  %v297_v22 = vld [vmem:[#allocation2 + $0x8] sm:$0xf]  ;;  %v341_v39 = vsel %vm340_vm2, %v339_v35, %v338_v30  ;;  %vm343_vm7 = vcmp.ne.s16.totalorder %v339_v35, 0  ;;  %v380_v44 = vsel %vm379_vm6, %v378_v40, %v377_v36  ;;  %vm382_vm9 = vcmp.ne.s16.totalorder %v378_v40, 0 }
  0x98   : > { %229 = vrot.lane.b32.xlu0 %v830_v19, %s742_s8  ;;  %v360_v26 = vld [vmem:[#allocation2 + $0x8] sm:$0xf]  ;;  %v256_v32 = vsel %vm254_vm14, %v830_v19, 0  ;;  %v281_v38 = vsel %vm279_vm1, %v830_v19, 0  ;;  %v320_v43 = vsel %vm318_vm5, %v830_v19, 0  ;;  %vm342_vm8 = vcmp.ne.s16.totalorder %v341_v39, 0 }
  0x99   : > { %v242_v27 = vld [vmem:[#allocation2 + $0x8] sm:$0xf]  ;;  %v344_v47 = vsel %vm342_vm8, %v830_v19, 0  ;;  %vm381_vm10 = vcmp.ne.s16.totalorder %v380_v44, 0  ;;  %v223_v59 = vsel %vm824_vm4, %v830_v19, 0  ;;  %vm292_vm4 = vcmask 916480  }
  0x9a   : > { %v257_v31 = vsel %vm255_vm13, %v242_v27, 0  ;;  %v272_v33 = vld [vmem:[#allocation2 + $0x8] sm:$0xf]  ;;  %v383_v50 = vsel %vm381_vm10, %v830_v19, 0  ;;  %vm267_vm13 = vcmask 1031168   ;;  %vm307_vm14 = vcmask 908288  }
  0x9b   : > { %302 = vrot.lane.b32.xlu1 %v297_v22, %s743_s9  ;;  %v282_v37 = vsel %vm280_vm0, %v272_v33, 0  ;;  %v312_v41 = vld [vmem:[#allocation2 + $0x8] sm:$0xf]  ;;  %vm370_vm0 = vcmask 777216   ;;  %vm355_vm1 = vcmask 785408   ;;  %vm394_vm2 = vcmask 769024  }
  0x9c   : > { %300 = vrot.lane.b32.xlu0 %v830_v19, %s743_s9  ;;  %v321_v42 = vsel %vm319_vm3, %v312_v41, 0  ;;  %v336_v45 = vld [vmem:[#allocation2 + $0x8] sm:$0xf]  ;;  %vm459_vm3 = vcmask 588800   ;;  %s866_s9 = scalar_lea.hbm %s911_s3, %s615_s4 }
  0x9d   : > { %v345_v46 = vsel %vm343_vm7, %v336_v45, 0  ;;  %v375_v48 = vld [vmem:[#allocation2 + $0x8] sm:$0xf] }
  0x9e   : > { %v384_v49 = vsel %vm382_vm9, %v375_v48, 0  ;;  %v398_v48 = vld [vmem:[%s909_s1] sm:$0xf] }
  0x9f   : > { %365 = vrot.lane.b32.xlu1 %v360_v26, %s744_s10 }
  0xa0   : > { %363 = vrot.lane.b32.xlu0 %v830_v19, %s744_s10  ;;  %s671_s10 = scalar_lea.vmem %s868_s6, 256 }
  0xa1   : > { %p672_p11 = scmp.ne.s32.totalorder %s868_s6, %s671_s10 }
  0xa3   : > { %262 = vrot.lane.b32.xlu1 %v257_v31, %s745_s11  ;;  %p673_p12 = pnand %p672_p11, %p809_p5 }
  0xa4   : > { %260 = vrot.lane.b32.xlu0 %v256_v32, %s745_s11  ;;  %s750_s11 = smov [#allocation4]  }
  0xa5   : > { %p674_p13 = pneg %p673_p12 }
  0xa7   : > { %287 = vrot.lane.b32.xlu1 %v282_v37, %s746_s17 }
  0xa8   : > { %285 = vrot.lane.b32.xlu0 %v281_v38, %s746_s17  ;;  %s675_s17 = sshll.u32 %s750_s11, 4  ;;  %s676_s17 = int_to_ptr.vmem [resolvable:$false] %s675_s17 }
  0xa9   : > { %p678_p0 = scmp.lt.s32.totalorder %s868_s6, %s676_s17 }
  0xab   : > { %326 = vrot.lane.b32.xlu1 %v321_v42, %s747_s19 }
  0xac   : > { %324 = vrot.lane.b32.xlu0 %v320_v43, %s747_s19  ;;  %s677_s19 = scalar_lea.vmem %s676_s17, 512 }
  0xad   : > { %p679_p1 = scmp.lt.s32.totalorder %s677_s19, %s671_s10 }
  0xaf   : > { %350 = vrot.lane.b32.xlu1 %v345_v46, %s748_s20  ;;  %p680_p2 = por %p679_p1, %p678_p0 }
  0xb0   : > { %348 = vrot.lane.b32.xlu0 %v344_v47, %s748_s20 }
  0xb1   : > { %p681_p3 = pnand %p680_p2, %p674_p13 }
  0xb3   : > { %389 = vrot.lane.b32.xlu1 %v384_v49, %s749_s24 }
  0xb4   : > { %387 = vrot.lane.b32.xlu0 %v383_v50, %s749_s24 }
  0xb8   : > { %411 = vperm.xlu0 %670, %v408_v51  }
 0x109   : > { %v232_v52 = vpop.permute.xlu1 %231 }
 0x10a   : > { %v234_v53 = vrot.slane %v232_v52, 4  ;;  %v230_v54 = vpop.permute.xlu0 %229 }
 0x10b   : > { %v233_v55 = vrot.slane %v230_v54, 4 }
 0x10d   : > { %v303_v56 = vpop.permute.xlu1 %302  ;;  %v236_v57 = vsel %vm235_vm11, %v233_v55, %v234_v53 }
 0x10e   : > { %v301_v58 = vpop.permute.xlu0 %300  ;;  %v238_v60 = vsel %vm237_vm12, %v230_v54, %v236_v57  ;;  %v305_v5 = vrot.slane %v303_v56, 4 }
 0x10f   : > { %v598_v61 = vcombine.high %v223_v59, %v238_v60  ;;  %v597_v62 = vcombine.low %v223_v59, %v238_v60  ;;  %v304_v6 = vrot.slane %v301_v58, 4 }
 0x111   : > { %v366_v63 = vpop.permute.xlu1 %365  ;;  %470 = vmatprep.subr.bf16.mxu0 %v598_v61  ;;  %v306_v12 = vsel %vm235_vm11, %v304_v6, %v305_v5 }
 0x112   : > { %471 = vmatpush1.bf16.msra.mxu0 %v597_v62  ;;  %v364_v0 = vpop.permute.xlu0 %363  ;;  %v368_v15 = vrot.slane %v366_v63, 4  ;;  %v308_v26 = vsel %vm307_vm14, %v301_v58, %v306_v12 }
 0x113   : > { %v367_v20 = vrot.slane %v364_v0, 4 }
 0x115   : > { %v263_v1 = vpop.permute.xlu1 %262  ;;  %v369_v30 = vsel %vm235_vm11, %v367_v20, %v368_v15 }
 0x116   : > { %v261_v2 = vpop.permute.xlu0 %260  ;;  %v265_v3 = vrot.slane %v263_v1, 4  ;;  %v371_v36 = vsel %vm370_vm0, %v364_v0, %v369_v30 }
 0x117   : > { %v264_v4 = vrot.slane %v261_v2, 4 }
 0x119   : > { %v288_v7 = vpop.permute.xlu1 %287  ;;  %v266_v10 = vsel %vm235_vm11, %v264_v4, %v265_v3 }
 0x11a   : > { %v290_v8 = vrot.slane %v288_v7, 4  ;;  %v286_v9 = vpop.permute.xlu0 %285  ;;  %v268_v16 = vsel %vm267_vm13, %v261_v2, %v266_v10 }
 0x11b   : > { %v289_v11 = vrot.slane %v286_v9, 4 }
 0x11d   : > { %v291_v13 = vsel %vm235_vm11, %v289_v11, %v290_v8  ;;  %v327_v14 = vpop.permute.xlu1 %326 }
 0x11e   : > { %v293_v17 = vsel %vm292_vm4, %v286_v9, %v291_v13  ;;  %v329_v18 = vrot.slane %v327_v14, 4  ;;  %v325_v19 = vpop.permute.xlu0 %324 }
 0x11f   : > { %v599_v21 = vcombine.low %v268_v16, %v293_v17  ;;  %v600_v22 = vcombine.high %v268_v16, %v293_v17  ;;  %v328_v23 = vrot.slane %v325_v19, 4 }
 0x121   : > { %v330_v24 = vsel %vm235_vm11, %v328_v23, %v329_v18  ;;  %v351_v25 = vpop.permute.xlu1 %350  ;;  %472 = vmatprep.subr.bf16.mxu0 %v600_v22 }
 0x122   : > { %v332_v27 = vsel %vm331_vm15, %v325_v19, %v330_v24  ;;  %v353_v28 = vrot.slane %v351_v25, 4  ;;  %473 = vmatpush1.bf16.msra.mxu0 %v599_v21  ;;  %v349_v29 = vpop.permute.xlu0 %348 }
 0x123   : > { %v601_v31 = vcombine.low %v308_v26, %v332_v27  ;;  %v602_v32 = vcombine.high %v308_v26, %v332_v27  ;;  %v352_v33 = vrot.slane %v349_v29, 4 }
 0x125   : > { %v354_v34 = vsel %vm235_vm11, %v352_v33, %v353_v28  ;;  %v390_v35 = vpop.permute.xlu1 %389  ;;  %474 = vmatprep.subr.bf16.mxu0 %v602_v32 }
 0x126   : > { %v356_v37 = vsel %vm355_vm1, %v349_v29, %v354_v34  ;;  %v392_v38 = vrot.slane %v390_v35, 4  ;;  %475 = vmatpush1.bf16.msra.mxu0 %v601_v31  ;;  %v388_v39 = vpop.permute.xlu0 %387 }
 0x127   : > { %v603_v40 = vcombine.low %v356_v37, %v371_v36  ;;  %v604_v41 = vcombine.high %v356_v37, %v371_v36  ;;  %v391_v42 = vrot.slane %v388_v39, 4 }
 0x129   : > { %v393_v43 = vsel %vm235_vm11, %v391_v42, %v392_v38  ;;  %476 = vmatprep.subr.bf16.mxu0 %v604_v41 }
 0x12a   : > { %v395_v44 = vsel %vm394_vm2, %v388_v39, %v393_v43  ;;  %477 = vmatpush1.bf16.msra.mxu0 %v603_v40 }
 0x12b   : > { %v605_v45 = vcombine.low %v395_v44, %v395_v44  ;;  %v606_v46 = vcombine.high %v395_v44, %v395_v44 }
 0x12d   : > { %607 = vmatprep.subr.msk.bf16.mxu0 %vm235_vm11, %v606_v46  ;;  %v465_v47 = vsel %vm235_vm11, %v605_v45, 0 }
 0x12e   : > { %479 = vmatpush1.bf16.msra.mxu0 %v465_v47 }
 0x131   : > { %608 = vmatmul.mubr.msk.bf16.vlgmr.msra.gmra.mrb[0].mxu0 %vm459_vm3, %v398_v48 }
 0x137   : > { %v412_v49 = vpop.permute.xlu0 %411 }
 0x204   : > { %v504_v50 = vpop.f32.mrb[0].mxu0 }
 0x205   : > { %v505_v51 = vadd.f32 %v504_v50, %v412_v49  ;;  %v506_v52 = vpop.f32.mrb[1].mxu0 }
 0x206   : > { %v507_v53 = vadd.f32 %v506_v52, %v412_v49  ;;  %v508_v54 = vpop.f32.mrb[2].mxu0 }
 0x207   : > { %v511_v55 = vmax.f32 %v505_v51, 0.0  ;;  %v509_v56 = vpop.f32.mrb[3].mxu0 }
 0x208   : > { %v512_v57 = vmax.f32 %v507_v53, 0.0 }
 0x209   : > { %513 = vst [vmem:[%s163_s5] sm:$0xff] %v511_v55 }
 0x20a   : > { %514 = vst [vmem:[%s163_s5 + $0x8] sm:$0xff] %v512_v57 }
 0x20b   : > { %684 = shalt.err (!%p681_p3)
}
 0x20c   : > { %s685_s20 = scalar_lea.hbm %s866_s9, 256  ;;  %s689_s26 = scalar_lea.hbm %s911_s3, 512 }
 0x20d   : > { %p686_p4 = scmp.ne.s32.totalorder %s866_s9, %s685_s20  ;;  %p690_p9 = scmp.lt.u32.totalorder %s866_s9, %s911_s3 }
 0x20e   : > { %p691_p10 = scmp.lt.u32.totalorder %s689_s26, %s685_s20  ;;  %p693_p12 = scmp.lt.u32.totalorder %s685_s20, %s866_s9 }
 0x20f   : > { %p687_p7 = pnand %p686_p4, %p809_p5 }
 0x210   : > { %p692_p11 = por %p691_p10, %p690_p9 }
 0x211   : > { %p688_p8 = pneg %p687_p7 }
 0x212   : > { %p694_p13 = por %p693_p12, %p692_p11 }
 0x214   : > { %p695_p0 = pnand %p694_p13, %p688_p8 }
 0x216   : > { %698 = shalt.err (!%p695_p0)
}
 0x217   : > { %616 = dma.vmem_to_hbm [thread:$0]  (%p809_p5), %s868_s6, 256, %s866_s9, %s516_s16  }
 0x218 PF: > { %p622_p1 = scmp.ge.s32.totalorder %s733_s15, 2  ;;  %s542_s29 = sand.u32 1, %s721_s12  }
 0x219   : > { %s543_s30 = scalar_lea.sflag [#allocation5], %s542_s29 }
 0x21a   : > { %p619_p2 = pnand %p622_p1, %p813_p6 }
 0x21c   : > { %716 = dma.done.wait (!%p619_p2), %s543_s30, 256  }
 0x21d   : > { %718 = vsyncadd (!%p619_p2), %s543_s30, 4294967040  ;;  %p13_p3 = scmp.ge.s32.totalorder %s796_s18, 4   ;;  %s916_s12 = smov %s725_s13 }
 0x21e   : > { %s917_s13 = smov %s729_s14  ;;  %s918_s14 = smov %s807_s21 }
 0x21f   : > { %s919_s15 = smov %s796_s18  ;;  %15 = sbr.rel (!%p13_p3) target bundleno = 3 (0x3), region = 67 }
 0x226   :  { %548 = vsyncpa [#allocation5], 1 }
 0x227   :  { %550 = vsyncpa [#allocation5 + $0x1], 1 }

</bundles_post_ra>
